<compile_context>
chip_gen: v5e
topology: v5e:2x2
jax: 0.10.0
libtpu: 0.0.40
codegen_flags: <defaults>
</compile_context>

<pallas_src>
import functools
from typing import Any, NamedTuple, Tuple

import jax
import jax.numpy as jnp
from jax.experimental import pallas as pl
from jax.experimental.pallas import tpu as pltpu


# --------------------------------------------------------------------------- #
# Kernel
# --------------------------------------------------------------------------- #
def _mlp_kernel(num_layers, *refs):
    """Fused MLP over one M-tile.

    refs = (x_ref, w1, b1, w2, b2, ..., wL, bL, out_ref)
    Feature dims are lane-padded; every matmul accumulates in f32 on the MXU.
    """
    x_ref = refs[0]
    out_ref = refs[-1]
    params = refs[1:-1]
    assert len(params) == 2 * num_layers

    h = x_ref[...]
    for i in range(num_layers):
        w = params[2 * i][...]        # (d_in_p, d_out_p), stored/compute dtype
        b = params[2 * i + 1][...]    # (1, d_out_p)
        acc = jnp.dot(h.astype(w.dtype), w, preferred_element_type=jnp.float32)
        acc = acc + b.astype(jnp.float32)
        if i < num_layers - 1:
            # ReLU, then drop straight back to the compute dtype so the carried
            # activation doesn't spill a full f32 tile between matmuls
            # (no-op when everything is f32).
            h = jnp.maximum(acc, 0.0).astype(w.dtype)
        else:
            h = acc
    out_ref[...] = h.astype(out_ref.dtype)


# --------------------------------------------------------------------------- #
# Helpers
# --------------------------------------------------------------------------- #
def _round_up(v, m):
    return ((v + m - 1) // m) * m


def _sublane_multiple(dtype):
    # Rows per packed sublane group: 8 for 4-byte, 16 for 2-byte, 32 for 1-byte.
    return max(8, 32 // jnp.dtype(dtype).itemsize)


@functools.lru_cache(maxsize=None)
def _vmem_capacity_bytes():
    try:
        return int(pltpu.get_tpu_info().vmem_capacity_bytes)
    except Exception:
        return 64 << 20  # conservative (v7x-sized) default if the query fails


@functools.lru_cache(maxsize=None)
def _single_buffer_params_supported():
    """One-time capability probe: can BlockSpec take pipeline_mode=pl.Buffered(1)?"""
    if not hasattr(pl, "Buffered"):
        return False
    try:
        def _probe(x_ref, o_ref):
            o_ref[...] = x_ref[...]

        x = jnp.zeros((8, 128), jnp.float32)
        f = pl.pallas_call(
            _probe,
            out_shape=jax.ShapeDtypeStruct((8, 128), jnp.float32),
            grid=(1,),
            in_specs=[pl.BlockSpec((8, 128), lambda i: (0, 0),
                                   pipeline_mode=pl.Buffered(1))],
            out_specs=pl.BlockSpec((8, 128), lambda i: (0, 0)),
        )
        jax.block_until_ready(f(x))
        return True
    except Exception:
        return False


def _estimate_vmem(tile_m, dims_p, resident_param_bytes, act_itemsize):
    # double-buffered x tile + double-buffered out tile (assume f32 out) +
    # resident params + f32 intermediate headroom.
    io = 2 * tile_m * dims_p[0] * act_itemsize + 2 * tile_m * dims_p[-1] * 4
    acc = 2 * tile_m * max(dims_p) * 4
    return io + resident_param_bytes + acc


def _pick_tile_m(m, row_mult, max_tile_m):
    """Pick an M tile: big tiles for big M, >=2 balanced tiles for small M."""
    mxu = 256
    max_tile = _round_up(max(max_tile_m, mxu), mxu)
    if m >= 2 * max_tile:
        return max_tile
    # Small/medium M: split into (at least) 2 balanced tiles so both v7x
    # TensorCores get work; snap up to an MXU multiple only when that costs
    # less than ~12% extra (padded) rows.
    half = max(-(-m // 2), row_mult)
    snapped = _round_up(half, mxu)
    if snapped <= max_tile and (2 * snapped - m) * 8 <= m:
        return snapped
    return min(_round_up(half, row_mult), max_tile)


# --------------------------------------------------------------------------- #
# Parameter preparation (hoisted out of the per-call path)
# --------------------------------------------------------------------------- #
class PreparedMLPParams(NamedTuple):
    weights_p: Tuple[Any, ...]
    biases_p: Tuple[Any, ...]
    dims: Tuple[int, ...]       # true feature dims [in, h, ..., out]
    dims_p: Tuple[int, ...]     # lane-padded feature dims
    param_bytes: int
    compute_dtype: Any


def prepare_mlp_params(weights, biases, *, lane=128, compute_dtype=None):
    """Pad all feature dims to lane multiples (and optionally cast to a compute
    dtype, e.g. bf16) ONCE.  Reuse the result for every forward call."""
    num_layers = len(weights)
    assert len(biases) == num_layers
    dims = [weights[0].shape[0]] + [w.shape[1] for w in weights]
    dims_p = [_round_up(d, lane) for d in dims]

    weights_p, biases_p = [], []
    param_bytes = 0
    for i, (w, b) in enumerate(zip(weights, biases)):
        if compute_dtype is not None:
            w = w.astype(compute_dtype)
            b = b.astype(compute_dtype)
        d_in, d_out = w.shape
        assert d_in == dims[i] and d_out == dims[i + 1]
        w_p = jnp.pad(w, ((0, dims_p[i] - d_in), (0, dims_p[i + 1] - d_out)))
        b_p = jnp.pad(b.reshape(1, -1), ((0, 0), (0, dims_p[i + 1] - d_out)))
        weights_p.append(w_p)
        biases_p.append(b_p)
        param_bytes += w_p.size * w_p.dtype.itemsize
        param_bytes += b_p.size * b_p.dtype.itemsize

    cd = jnp.dtype(compute_dtype) if compute_dtype is not None else jnp.dtype(weights[0].dtype)
    return PreparedMLPParams(tuple(weights_p), tuple(biases_p), tuple(dims),
                             tuple(dims_p), int(param_bytes), cd)


# --------------------------------------------------------------------------- #
# Wrapper
# --------------------------------------------------------------------------- #
def mlp_pallas(x, weights=None, biases=None, *, prepared=None, tile_m=None,
               max_tile_m=512, lane=128, compute_dtype=None, interpret=False):
    """Run the fused MLP kernel.

    x        : (..., input_dim)
    weights  : list of (d_in, d_out) arrays (y = x @ W + b, i.e. torch W.T)
    biases   : list of (d_out,) arrays
    prepared : optional PreparedMLPParams (pad/cast hoisted out of this call)
    """
    if prepared is None:
        prepared = prepare_mlp_params(weights, biases, lane=lane,
                                      compute_dtype=compute_dtype)

    num_layers = len(prepared.weights_p)
    dims, dims_p = prepared.dims, prepared.dims_p
    in_dim, out_dim = dims[0], dims[-1]
    assert x.shape[-1] == in_dim
    out_dtype = x.dtype
    lead_shape = x.shape[:-1]

    x2d = x.reshape(-1, in_dim)
    if x2d.dtype != prepared.compute_dtype:
        x2d = x2d.astype(prepared.compute_dtype)   # opt-in bf16 streaming path
    if dims_p[0] != in_dim:
        x2d = jnp.pad(x2d, ((0, 0), (0, dims_p[0] - in_dim)))
    m = x2d.shape[0]

    act_itemsize = jnp.dtype(x2d.dtype).itemsize
    row_mult = _sublane_multiple(x2d.dtype)

    vmem_cap = _vmem_capacity_bytes()
    single_buffer = _single_buffer_params_supported()
    resident_param_bytes = prepared.param_bytes * (1 if single_buffer else 2)

    # ---- M tiling
    if tile_m is None:
        mt = max_tile_m
        # Grow toward 1024-row tiles when the full working set stays well under
        # half of physical VMEM (cheap on v5e/v6e's 128 MiB; still safe on v7x).
        if _estimate_vmem(1024, dims_p, resident_param_bytes, act_itemsize) <= vmem_cap // 2:
            mt = max(mt, 1024)
        tile_m = _pick_tile_m(m, row_mult, mt)
    else:
        tile_m = max(row_mult, _round_up(tile_m, row_mult))
    tile_m = min(tile_m, _round_up(m, row_mult))

    grid = (pl.cdiv(m, tile_m),)   # no M padding: ragged last block is masked

    # ---- generation-aware VMEM budget (≈54 MiB ceiling on v7x, ≈108 MiB on v5e/v6e)
    vmem_need = _estimate_vmem(tile_m, dims_p, resident_param_bytes, act_itemsize)
    vmem_limit = int(1.25 * vmem_need) + (4 << 20)
    vmem_limit = max(32 << 20, min(vmem_limit, int(vmem_cap * 0.85)))
    # TODO(synk): for hidden dims >= ~1536 (f32) on v7x, add a K/N reduction grid
    # axis with an f32 VMEM accumulator + pl.when init/finalize instead of keeping
    # all padded weights resident.

    param_kwargs = {"pipeline_mode": pl.Buffered(1)} if single_buffer else {}
    in_specs = [pl.BlockSpec((tile_m, dims_p[0]), lambda i: (i, 0))]
    flat_args = [x2d]
    for w_p, b_p in zip(prepared.weights_p, prepared.biases_p):
        in_specs.append(pl.BlockSpec(w_p.shape, lambda i: (0, 0), **param_kwargs))
        in_specs.append(pl.BlockSpec(b_p.shape, lambda i: (0, 0), **param_kwargs))
        flat_args.append(w_p)
        flat_args.append(b_p)
    out_spec = pl.BlockSpec((tile_m, dims_p[-1]), lambda i: (i, 0))

    flops = 2 * m * sum(a * b for a, b in zip(dims_p[:-1], dims_p[1:]))
    bytes_accessed = (m * dims_p[0] * act_itemsize
                      + m * dims_p[-1] * jnp.dtype(out_dtype).itemsize
                      + prepared.param_bytes)

    out2d = pl.pallas_call(
        functools.partial(_mlp_kernel, num_layers),
        out_shape=jax.ShapeDtypeStruct((m, dims_p[-1]), out_dtype),
        grid_spec=pltpu.PrefetchScalarGridSpec(
            num_scalar_prefetch=0,
            grid=grid,
            in_specs=in_specs,
            out_specs=out_spec,
        ),
        compiler_params=pltpu.CompilerParams(
            dimension_semantics=("parallel",),
            vmem_limit_bytes=vmem_limit,
        ),
        cost_estimate=pl.CostEstimate(
            flops=int(flops), transcendentals=0, bytes_accessed=int(bytes_accessed)),
        interpret=interpret,
    )(*flat_args)

    if dims_p[-1] != out_dim:
        out2d = out2d[:, :out_dim]
    return out2d.reshape(*lead_shape, out_dim)


# --------------------------------------------------------------------------- #
# Parameter init + reference
# --------------------------------------------------------------------------- #
def init_mlp_params(key, input_dim, hidden_dim, output_dim, num_layers,
                    dtype=jnp.float32):
    """Deterministic synthetic parameters matching nn.Linear shapes.

    Layer i maps dims[i] -> dims[i+1]; weight stored as (d_in, d_out)."""
    h = [hidden_dim] * (num_layers - 1)
    dims = [input_dim] + h + [output_dim]
    weights, biases = [], []
    for i in range(num_layers):
        key, kw, kb = jax.random.split(key, 3)
        d_in, d_out = dims[i], dims[i + 1]
        bound = 1.0 / (d_in ** 0.5)  # torch.nn.Linear default init range
        weights.append(
            jax.random.uniform(kw, (d_in, d_out), jnp.float32, -bound, bound
                               ).astype(dtype))
        biases.append(
            jax.random.uniform(kb, (d_out,), jnp.float32, -bound, bound
                               ).astype(dtype))
    return weights, biases


def mlp_reference(x, weights, biases):
    """Plain-JAX reference for correctness checking."""
    h = x.astype(jnp.float32)
    n = len(weights)
    for i, (w, b) in enumerate(zip(weights, biases)):
        h = h @ w.astype(jnp.float32) + b.astype(jnp.float32)
        if i < n - 1:
            h = jnp.maximum(h, 0.0)
    return h


# --------------------------------------------------------------------------- #
# Demo / correctness checks
# --------------------------------------------------------------------------- #
if __name__ == "__main__":
    key = jax.random.PRNGKey(0)

    # ---- Check 1: tiny shapes (same usage pattern as the module: (B, Q, C)).
    batch, num_queries = 2, 8
    input_dim, hidden_dim, output_dim, num_layers = 32, 64, 16, 3

    key, kx = jax.random.split(key)
    x = jax.random.normal(kx, (batch, num_queries, input_dim), jnp.float32)
    weights, biases = init_mlp_params(key, input_dim, hidden_dim, output_dim,
                                      num_layers)
    prep = prepare_mlp_params(weights, biases)          # hoisted (pad once)

    out = mlp_pallas(x, prepared=prep)
    out = jax.block_until_ready(out)
    ref = mlp_reference(x, weights, biases)
    assert out.shape == (batch, num_queries, output_dim)
    assert jnp.allclose(out, ref, atol=1e-5, rtol=1e-5), "mismatch (small case)"

    # ---- Check 2: Mask2Former-like dims — exercises the 2-tile balanced grid
    #               and the ragged (masked-store) last M block (M=600).
    batch2, num_queries2 = 2, 300
    in2, hid2, out2d, nl2 = 256, 256, 64, 3
    key, kx2 = jax.random.split(key)
    x2 = jax.random.normal(kx2, (batch2, num_queries2, in2), jnp.float32)
    w2, b2 = init_mlp_params(key, in2, hid2, out2d, nl2)
    prep2 = prepare_mlp_params(w2, b2)

    y2 = mlp_pallas(x2, prepared=prep2)
    y2 = jax.block_until_ready(y2)
    r2 = mlp_reference(x2, w2, b2)
    assert y2.shape == (batch2, num_queries2, out2d)
    assert jnp.allclose(y2, r2, atol=1e-3, rtol=1e-3), "mismatch (large case)"

    # ---- Check 3: opt-in bf16 compute path (weights + streamed activation in
    #               bf16, f32 MXU accumulation).  Looser tolerance by design.
    prep3 = prepare_mlp_params(w2, b2, compute_dtype=jnp.bfloat16)
    y3 = mlp_pallas(x2, prepared=prep3)
    y3 = jax.block_until_ready(y3)
    assert y3.shape == (batch2, num_queries2, out2d)
    assert y3.dtype == x2.dtype
    assert jnp.allclose(y3.astype(jnp.float32), r2, atol=5e-2, rtol=5e-2), \
        "mismatch (bf16 case)"

    print("KERNEL_OK")
</pallas_src>

<mosaic_0001>
module attributes {stable_mosaic.version = 11 : i64} {
  func.func @_probe(%arg0: i32, %arg1: memref<8x128xf32, #tpu.memory_space<vmem>>, %arg2: memref<8x128xf32, #tpu.memory_space<vmem>>) attributes {dimension_semantics = [#tpu.dimension_semantics<arbitrary>], iteration_bounds = array<i64: 1>, scalar_prefetch = 0 : i64, scratch_operands = 0 : i64, tpu.core_type = #tpu.core_type<tc>, window_params = [{pipeline_mode = #tpu.pipeline_mode<synchronous>, transform_indices = @transform_0, window_bounds = array<i64: 8, 128>}, {pipeline_mode = #tpu.pipeline_mode<synchronous>, transform_indices = @transform_1, window_bounds = array<i64: 8, 128>}]} {
    %c0 = arith.constant 0 : index
    %c0_0 = arith.constant 0 : index
    %0 = vector.load %arg1[%c0, %c0_0] : memref<8x128xf32, #tpu.memory_space<vmem>>, vector<8x128xf32>
    %c0_1 = arith.constant 0 : index
    %c0_2 = arith.constant 0 : index
    %1 = vector.load %arg2[%c0_1, %c0_2] : memref<8x128xf32, #tpu.memory_space<vmem>>, vector<8x128xf32>
    tpu.vector_store %arg2[%c0_1, %c0_2], %0 {strides = array<i32>} : memref<8x128xf32, #tpu.memory_space<vmem>>, vector<8x128xf32>,
    return
  }
  func.func @transform_0(%arg0: i32) -> (i32, i32) {
    %c0_i32 = arith.constant 0 : i32
    %c0_i32_0 = arith.constant 0 : i32
    %c0_i32_1 = arith.constant 0 : i32
    return %c0_i32, %c0_i32_0 : i32, i32
  }
  func.func @transform_1(%arg0: i32) -> (i32, i32) {
    %c0_i32 = arith.constant 0 : i32
    %c0_i32_0 = arith.constant 0 : i32
    %c0_i32_1 = arith.constant 0 : i32
    return %c0_i32, %c0_i32_0 : i32, i32
  }
}

module attributes {stable_mosaic.version = 11 : i64} {
  func.func @_mlp_kernel(%arg0: i32, %arg1: memref<8x128xf32, #tpu.memory_space<vmem>>, %arg2: memref<128x128xf32, #tpu.memory_space<vmem>>, %arg3: memref<1x128xf32, #tpu.memory_space<vmem>>, %arg4: memref<128x128xf32, #tpu.memory_space<vmem>>, %arg5: memref<1x128xf32, #tpu.memory_space<vmem>>, %arg6: memref<128x128xf32, #tpu.memory_space<vmem>>, %arg7: memref<1x128xf32, #tpu.memory_space<vmem>>, %arg8: memref<8x128xf32, #tpu.memory_space<vmem>>) attributes {dimension_semantics = [#tpu.dimension_semantics<parallel>], iteration_bounds = array<i64: 2>, scalar_prefetch = 0 : i64, scratch_operands = 0 : i64, tpu.core_type = #tpu.core_type<tc>, window_params = [{transform_indices = @transform_0, window_bounds = array<i64: 8, 128>}, {pipeline_mode = #tpu.pipeline_mode<synchronous>, transform_indices = @transform_1, window_bounds = array<i64: 128, 128>}, {pipeline_mode = #tpu.pipeline_mode<synchronous>, transform_indices = @transform_2, window_bounds = array<i64: 1, 128>}, {pipeline_mode = #tpu.pipeline_mode<synchronous>, transform_indices = @transform_3, window_bounds = array<i64: 128, 128>}, {pipeline_mode = #tpu.pipeline_mode<synchronous>, transform_indices = @transform_4, window_bounds = array<i64: 1, 128>}, {pipeline_mode = #tpu.pipeline_mode<synchronous>, transform_indices = @transform_5, window_bounds = array<i64: 128, 128>}, {pipeline_mode = #tpu.pipeline_mode<synchronous>, transform_indices = @transform_6, window_bounds = array<i64: 1, 128>}, {transform_indices = @transform_7, window_bounds = array<i64: 8, 128>}]} {
    %c0 = arith.constant 0 : index
    %c0_0 = arith.constant 0 : index
    %0 = vector.load %arg1[%c0, %c0_0] : memref<8x128xf32, #tpu.memory_space<vmem>>, vector<8x128xf32>
    %c0_1 = arith.constant 0 : index
    %c0_2 = arith.constant 0 : index
    %1 = vector.load %arg2[%c0_1, %c0_2] : memref<128x128xf32, #tpu.memory_space<vmem>>, vector<128x128xf32>
    %c0_3 = arith.constant 0 : index
    %c0_4 = arith.constant 0 : index
    %2 = vector.load %arg3[%c0_3, %c0_4] : memref<1x128xf32, #tpu.memory_space<vmem>>, vector<1x128xf32>
    %cst = arith.constant dense<0.000000e+00> : vector<8x128xf32>
    %3 = tpu.matmul %0, %1, %cst {dimension_numbers = #tpu.dot_dimension_numbers<[1], [0], [0], [1], [0, 0, 1, 1], [], []>} : vector<8x128xf32>, vector<128x128xf32>, vector<8x128xf32> -> vector<8x128xf32>
    %4 = vector.broadcast %2 : vector<1x128xf32> to vector<8x128xf32>
    %5 = arith.addf %3, %4 : vector<8x128xf32>
    %cst_5 = arith.constant 0.000000e+00 : f32
    %6 = vector.broadcast %cst_5 : f32 to vector<8x128xf32>
    %7 = arith.maximumf %5, %6 : vector<8x128xf32>
    %c0_6 = arith.constant 0 : index
    %c0_7 = arith.constant 0 : index
    %8 = vector.load %arg4[%c0_6, %c0_7] : memref<128x128xf32, #tpu.memory_space<vmem>>, vector<128x128xf32>
    %c0_8 = arith.constant 0 : index
    %c0_9 = arith.constant 0 : index
    %9 = vector.load %arg5[%c0_8, %c0_9] : memref<1x128xf32, #tpu.memory_space<vmem>>, vector<1x128xf32>
    %cst_10 = arith.constant dense<0.000000e+00> : vector<8x128xf32>
    %10 = tpu.matmul %7, %8, %cst_10 {dimension_numbers = #tpu.dot_dimension_numbers<[1], [0], [0], [1], [0, 0, 1, 1], [], []>} : vector<8x128xf32>, vector<128x128xf32>, vector<8x128xf32> -> vector<8x128xf32>
    %11 = vector.broadcast %9 : vector<1x128xf32> to vector<8x128xf32>
    %12 = arith.addf %10, %11 : vector<8x128xf32>
    %cst_11 = arith.constant 0.000000e+00 : f32
    %13 = vector.broadcast %cst_11 : f32 to vector<8x128xf32>
    %14 = arith.maximumf %12, %13 : vector<8x128xf32>
    %c0_12 = arith.constant 0 : index
    %c0_13 = arith.constant 0 : index
    %15 = vector.load %arg6[%c0_12, %c0_13] : memref<128x128xf32, #tpu.memory_space<vmem>>, vector<128x128xf32>
    %c0_14 = arith.constant 0 : index
    %c0_15 = arith.constant 0 : index
    %16 = vector.load %arg7[%c0_14, %c0_15] : memref<1x128xf32, #tpu.memory_space<vmem>>, vector<1x128xf32>
    %cst_16 = arith.constant dense<0.000000e+00> : vector<8x128xf32>
    %17 = tpu.matmul %14, %15, %cst_16 {dimension_numbers = #tpu.dot_dimension_numbers<[1], [0], [0], [1], [0, 0, 1, 1], [], []>} : vector<8x128xf32>, vector<128x128xf32>, vector<8x128xf32> -> vector<8x128xf32>
    %18 = vector.broadcast %16 : vector<1x128xf32> to vector<8x128xf32>
    %19 = arith.addf %17, %18 : vector<8x128xf32>
    %c0_17 = arith.constant 0 : index
    %c0_18 = arith.constant 0 : index
    %20 = vector.load %arg8[%c0_17, %c0_18] : memref<8x128xf32, #tpu.memory_space<vmem>>, vector<8x128xf32>
    tpu.vector_store %arg8[%c0_17, %c0_18], %19 {strides = array<i32>} : memref<8x128xf32, #tpu.memory_space<vmem>>, vector<8x128xf32>,
    return
  }
  func.func @transform_0(%arg0: i32) -> (i32, i32) {
    %c0_i32 = arith.constant 0 : i32
    %c0_i32_0 = arith.constant 0 : i32
    return %arg0, %c0_i32 : i32, i32
  }
  func.func @transform_1(%arg0: i32) -> (i32, i32) {
    %c0_i32 = arith.constant 0 : i32
    %c0_i32_0 = arith.constant 0 : i32
    %c0_i32_1 = arith.constant 0 : i32
    return %c0_i32, %c0_i32_0 : i32, i32
  }
  func.func @transform_2(%arg0: i32) -> (i32, i32) {
    %c0_i32 = arith.constant 0 : i32
    %c0_i32_0 = arith.constant 0 : i32
    %c0_i32_1 = arith.constant 0 : i32
    return %c0_i32, %c0_i32_0 : i32, i32
  }
  func.func @transform_3(%arg0: i32) -> (i32, i32) {
    %c0_i32 = arith.constant 0 : i32
    %c0_i32_0 = arith.constant 0 : i32
    %c0_i32_1 = arith.constant 0 : i32
    return %c0_i32, %c0_i32_0 : i32, i32
  }
  func.func @transform_4(%arg0: i32) -> (i32, i32) {
    %c0_i32 = arith.constant 0 : i32
    %c0_i32_0 = arith.constant 0 : i32
    %c0_i32_1 = arith.constant 0 : i32
    return %c0_i32, %c0_i32_0 : i32, i32
  }
  func.func @transform_5(%arg0: i32) -> (i32, i32) {
    %c0_i32 = arith.constant 0 : i32
    %c0_i32_0 = arith.constant 0 : i32
    %c0_i32_1 = arith.constant 0 : i32
    return %c0_i32, %c0_i32_0 : i32, i32
  }
  func.func @transform_6(%arg0: i32) -> (i32, i32) {
    %c0_i32 = arith.constant 0 : i32
    %c0_i32_0 = arith.constant 0 : i32
    %c0_i32_1 = arith.constant 0 : i32
    return %c0_i32, %c0_i32_0 : i32, i32
  }
  func.func @transform_7(%arg0: i32) -> (i32, i32) {
    %c0_i32 = arith.constant 0 : i32
    %c0_i32_0 = arith.constant 0 : i32
    return %arg0, %c0_i32 : i32, i32
  }
}

</mosaic_0001>

<bundles_post_ra>
// kernel: tpu_custom_call.1
= control target key start
LH: loop header
LB: loop body
LE: loop exit
PB: predicated region body
PF: predicated region fallthrough
CT: control target
= control target key end

     0   :  { %6 = vsyncpa [#allocation3], 0  ;;  %s114_s0 = inlined_call_operand.hbm [shape: f32[8,128], index: 0, kind: input, shape index: {}]   ;;  %s115_s1 = inlined_call_operand.hbm [shape: f32[8,128], index: 1, kind: output, shape index: {}]  }
   0x1   :  { %7 = vsyncpa [#allocation4], 0  ;;  %s13_s8 = sshll.u32 %s114_s0, 4  ;;  %s96_s9 = smov [#allocation2]   ;;  %s14_s8 = int_to_ptr.hbm [resolvable:$true] %s13_s8 }
   0x2   :  { %s15_s10 = sshll.u32 %s96_s9, 4  ;;  %s16_s10 = int_to_ptr.vmem [resolvable:$true] %s15_s10 }
   0x3   :  { %18 = dma.hbm_to_vmem [thread:$0]  %s14_s8, 128, %s16_s10, [#allocation3]  }
   0x4   :  { %92 = dma.done.wait [#allocation3], 128  }
   0x5   :  { %93 = vsyncadd [#allocation3], 4294967168  ;;  %s97_s11 = smov [#allocation5]   ;;  %s32_s15 = sshll.u32 %s115_s1, 4  ;;  %v23_v0 = vld [vmem:[#allocation2] sm:$0xff]  ;;  %s33_s15 = int_to_ptr.hbm [resolvable:$true] %s32_s15 }
   0x6   :  { %s30_s12 = sshll.u32 %s97_s11, 4  ;;  %24 = vst [vmem:[#allocation5] sm:$0xff] %v23_v0  ;;  %s31_s12 = int_to_ptr.vmem [resolvable:$true] %s30_s12 }
   0x7   :  { %35 = dma.vmem_to_hbm [thread:$0]  %s31_s12, 128, %s33_s15, [#allocation4]  }
   0x8   :  { %94 = dma.done.wait [#allocation4], 128  }
   0x9   :  { %95 = vsyncadd [#allocation4], 4294967168 }
   0xa   :  { %40 = vsyncpa [#allocation3], 1 }
   0xb   :  { %41 = vsyncpa [#allocation4], 1 }

// kernel: tpu_custom_call.1
= control target key start
LH: loop header
LB: loop body
LE: loop exit
PB: predicated region body
PF: predicated region fallthrough
CT: control target
= control target key end

     0   :  { %s1098_s0 = inlined_call_operand.hbm [shape: f32[16,128], index: 0, kind: input, shape index: {}]   ;;  %s1099_s1 = inlined_call_operand.hbm [shape: f32[128,128], index: 1, kind: input, shape index: {}]   ;;  %s1100_s2 = inlined_call_operand.vmem [shape: f32[1,128], index: 2, kind: input, shape index: {}]   ;;  %s1101_s3 = inlined_call_operand.hbm [shape: f32[128,128], index: 3, kind: input, shape index: {}]   ;;  %s1102_s4 = inlined_call_operand.vmem [shape: f32[1,128], index: 4, kind: input, shape index: {}]   ;;  %s1103_s5 = inlined_call_operand.hbm [shape: f32[128,128], index: 5, kind: input, shape index: {}]   ;;  %s1104_s6 = inlined_call_operand.vmem [shape: f32[1,128], index: 6, kind: input, shape index: {}]   ;;  %s1105_s7 = inlined_call_operand.hbm [shape: f32[16,128], index: 7, kind: output, shape index: {}]  }
   0x1   :  { %1106 = sst [smem:[#allocation15_spill]] %s1099_s1 }
   0x2   :  { %12 = vsyncpa [#allocation3], 0 }
   0x3   :  { %14 = vsyncpa [#allocation3 + $0x1], 0 }
   0x4   :  { %15 = vsyncpa [#allocation6], 0 }
   0x5   :  { %16 = vsyncpa [#allocation9], 0 }
   0x6   :  { %17 = vsyncpa [#allocation4], 0 }
   0x7   :  { %19 = vsyncpa [#allocation4 + $0x1], 0  ;;  %s926_s24 = smov 0   ;;  %s928_s25 = smov 0  }
   0x8   :  { %s930_s26 = smov 0   ;;  %s932_s27 = smov 0  }
   0x9 LB: > { %s1107_s1 = sld [smem:[#allocation15_spill]]  ;;  %s950_s8 = sadd.s32 4294967295, %s879_s27   ;;  %s879_s27 = sphi %s932_s27, %s1118_s27   ;;  %s875_s26 = sphi %s930_s26, %s1117_s26   ;;  %s871_s25 = sphi %s928_s25, %s1116_s25   ;;  %s867_s24 = sphi %s926_s24, %s1115_s24  }
   0xa   : > { %p586_p0 = scmp.ge.s32.totalorder %s879_s27, 1  ;;  %p46_p1 = scmp.eq.s32.totalorder %s950_s8, 0 }
   0xb   : > { %p208_p2 = scmp.lt.s32.totalorder %s879_s27, 3  ;;  %s881_s10 = smov [#allocation5]  }
   0xc   : > { %s221_s11 = sshll.u32 %s881_s10, 4  ;;  %s236_s14 = sshll.u32 %s1101_s3, 4  ;;  %s222_s11 = int_to_ptr.vmem [resolvable:$true] %s221_s11  ;;  %s237_s14 = int_to_ptr.hbm [resolvable:$true] %s236_s14 }
   0xd   : > { %p955_p3 = pnand %p586_p0, %p208_p2  ;;  %s253_s18 = sshll.u32 %s1103_s5, 4  ;;  %s254_s18 = int_to_ptr.hbm [resolvable:$true] %s253_s18 }
   0xe   : > { %s882_s19 = smov [#allocation7]   ;;  %s883_s21 = smov 128  }
   0xf   : > { %s219_s30 = sshll.u32 %s1107_s1, 4  ;;  %p619_p4 = pneg %p955_p3  ;;  %s220_s30 = int_to_ptr.hbm [resolvable:$true] %s219_s30 }
  0x10   : > { %s238_s20 = sshll.u32 %s882_s19, 4  ;;  %s884_s22 = smov 8   ;;  %s239_s20 = int_to_ptr.vmem [resolvable:$true] %s238_s20 }
  0x11   : > { %p967_p6 = pnand %p619_p4, %p46_p1  ;;  %s885_s23 = smov [#allocation8]  }
  0x12   : > { %s255_s28 = sshll.u32 %s885_s23, 4  ;;  %s585_s29 = sadd.s32 4294967294, %s879_s27   ;;  %s256_s28 = int_to_ptr.vmem [resolvable:$true] %s255_s28 }
  0x13   : > { %622 = dma.hbm_to_vmem [thread:$0]  (!%p967_p6), %s220_s30, 2048, %s222_s11, [#allocation6], %s883_s21, %s883_s21, %s884_s22  }
  0x14   : > { %625 = dma.hbm_to_vmem [thread:$0]  (!%p967_p6), %s237_s14, 2048, %s239_s20, [#allocation6], %s883_s21, %s883_s21, %s884_s22  }
  0x15   : > { %628 = dma.hbm_to_vmem [thread:$0]  (!%p967_p6), %s254_s18, 2048, %s256_s28, [#allocation9], %s883_s21, %s883_s21, %s884_s22  }
  0x16   : > { %s982_s10 = sadd.s32 1, %s879_s27   ;;  %s32_s12 = sadd.s32 1, %s875_s26 }
  0x17   : > { %s29_s30 = ssub.s32 %s879_s27, %s982_s10  ;;  %p39_p7 = scmp.ne.s32.totalorder %s875_s26, %s871_s25 }
  0x18   : > { %p30_p8 = scmp.eq.s32.totalorder %s29_s30, 0  ;;  %p40_p9 = scmp.eq.s32.totalorder %s879_s27, 0 }
  0x19   : > { %p45_p10 = scmp.ne.s32.totalorder %s871_s25, %s867_s24  ;;  %p195_p11 = scmp.eq.s32.totalorder %s950_s8, 1 }
  0x1a   : > { %s994_s11 = scalar_select %p30_p8, %s875_s26, %s32_s12  }
  0x1b   : > { %p998_p12 = por %p46_p1, %p45_p10  ;;  %p1002_p13 = por %p195_p11, %p39_p7 }
  0x1c   : > { %p201_p0 = scmp.eq.s32.totalorder %s585_s29, 1  ;;  %p41_p2 = por %p40_p9, %p39_p7 }
  0x1d   : > { %s272_s15 = sand.u32 1, %s875_s26   ;;  %p640_p6 = scmp.lt.s32.totalorder %s879_s27, 2 }
  0x1e   : > { %p1007_p4 = por %p201_p0, %p45_p10  ;;  %s591_s17 = sshll.u32 %s272_s15, 3 }
  0x1f   : > { %s592_s18 = sshll.u32 %s879_s27, 3  ;;  %s276_s23 = scalar_lea.vmem [#allocation2], %s591_s17 }
  0x20   : > { %s280_s21 = scalar_lea.hbm %s1098_s0, %s592_s18  ;;  %s284_s28 = sshll.u32 %s276_s23, 4  ;;  %s285_s28 = int_to_ptr.vmem [resolvable:$true] %s284_s28 }
  0x21   : > { %s282_s22 = sshll.u32 %s280_s21, 4  ;;  %p1016_p8 = pnand %p640_p6, %p41_p2  ;;  %s283_s22 = int_to_ptr.hbm [resolvable:$true] %s282_s22 }
  0x22   : > { %s273_s12 = scalar_lea.sflag [#allocation3], %s272_s15  ;;  %s775_s30 = sshra.s32 %s283_s22, 4  ;;  %s776_s30 = int_to_ptr.hbm [resolvable:$true] %s775_s30 }
  0x23   : > { %s777_s1 = scalar_lea.hbm %s776_s30, 8  ;;  %p779_p9 = pneg %p1016_p8 }
  0x24   : > { %p778_p7 = scmp.ne.s32.totalorder %s776_s30, %s777_s1  ;;  %s782_s17 = scalar_lea.hbm %s1098_s0, 16 }
  0x25   : > { %p783_p0 = scmp.lt.s32.totalorder %s776_s30, %s1098_s0  ;;  %p784_p2 = scmp.lt.s32.totalorder %s782_s17, %s777_s1 }
  0x26   : > { %p780_p10 = pnand %p779_p9, %p778_p7 }
  0x27   : > { %p785_p6 = por %p784_p2, %p783_p0 }
  0x28   : > { %p781_p11 = pneg %p780_p10 }
  0x2a   : > { %p786_p5 = pnand %p785_p6, %p781_p11 }
  0x2c   : > { %789 = shalt.err (!%p786_p5)
}
  0x2d   : > { %632 = dma.hbm_to_vmem [thread:$0]  (!%p1016_p8), %s283_s22, 128, %s285_s28, %s273_s12  }
  0x2e   : > { %293 = sbr.rel (%p955_p3) target bundleno = 485 (0x1e5), region = 48  ;;  %s1033_s15 = sand.u32 (!%p955_p3), 1, %s871_s25  }
  0x2f   : > { %s594_s23 = sshll.u32 (!%p955_p3), %s1033_s15, 3  ;;  %s296_s18 = scalar_lea.sflag (!%p955_p3), [#allocation3], %s1033_s15 }
  0x30   : > { %s1039_s1 = scalar_lea.vmem (!%p955_p3), [#allocation2], %s594_s23 }
  0x33   : > { %850 = dma.done.wait (%p998_p12), %s296_s18, 128  }
  0x34   : > { %852 = vsyncadd (%p998_p12), %s296_s18, 4294967168 }
  0x35   : > { %854 = dma.done.wait (%p46_p1), [#allocation6], 4096  }
  0x36   : > { %856 = vsyncadd (%p46_p1), [#allocation6], 4294963200 }
  0x37   : > { %858 = dma.done.wait (%p46_p1), [#allocation9], 2048  }
  0x38   : > { %860 = vsyncadd (%p46_p1), [#allocation9], 4294965248  ;;  %v362_v0 = vld [vmem:[#allocation5 + $0x78] sm:$0xff]  ;;  %v361_v1 = vld [vmem:[#allocation5 + $0x70] sm:$0xff]  ;;  %s600_s29 = sshll.u32 %s950_s8, 3  ;;  %s345_s21 = scalar_lea.vmem [#allocation10], %s594_s23 }
  0x39   : > { %367 = vmatpush.msra.mxu0 %v362_v0  ;;  %v360_v2 = vld [vmem:[#allocation5 + $0x68] sm:$0xff]  ;;  %v359_v3 = vld [vmem:[#allocation5 + $0x60] sm:$0xff]  ;;  %v403_v4 = vld [vmem:[#allocation7 + $0x78] sm:$0xff]  ;;  %s481_s19 = scalar_lea.hbm %s1105_s7, %s600_s29  ;;  %s483_s18 = sshll.u32 %s345_s21, 4  ;;  %s484_s18 = int_to_ptr.vmem [resolvable:$true] %s483_s18 }
  0x3a   : > { %v358_v5 = vld [vmem:[#allocation5 + $0x58] sm:$0xff]  ;;  %408 = vmatpush.msra.mxu1 %v403_v4  ;;  %v402_v6 = vld [vmem:[#allocation7 + $0x70] sm:$0xff]  ;;  %v401_v7 = vld [vmem:[#allocation7 + $0x68] sm:$0xff]  ;;  %s471_s9 = scalar_lea.sflag [#allocation4], %s1033_s15  ;;  %s825_s29 = scalar_lea.hbm %s1105_s7, 16 }
  0x3b   : > { %368 = vmatpush.msra.mxu0 %v361_v1  ;;  %v357_v8 = vld [vmem:[#allocation5 + $0x50] sm:$0xff]  ;;  %v400_v9 = vld [vmem:[#allocation7 + $0x60] sm:$0xff]  ;;  %v356_v10 = vld [vmem:[#allocation5 + $0x48] sm:$0xff] }
  0x3c   : > { %409 = vmatpush.msra.mxu1 %v402_v6  ;;  %v399_v11 = vld [vmem:[#allocation7 + $0x58] sm:$0xff]  ;;  %v355_v12 = vld [vmem:[#allocation5 + $0x40] sm:$0xff]  ;;  %v398_v13 = vld [vmem:[#allocation7 + $0x50] sm:$0xff] }
  0x3d   : > { %369 = vmatpush.msra.mxu0 %v360_v2  ;;  %v354_v14 = vld [vmem:[#allocation5 + $0x38] sm:$0xff]  ;;  %v397_v15 = vld [vmem:[#allocation7 + $0x48] sm:$0xff]  ;;  %v353_v16 = vld [vmem:[#allocation5 + $0x30] sm:$0xff] }
  0x3e   : > { %410 = vmatpush.msra.mxu1 %v401_v7  ;;  %v396_v17 = vld [vmem:[#allocation7 + $0x40] sm:$0xff]  ;;  %v352_v18 = vld [vmem:[#allocation5 + $0x28] sm:$0xff]  ;;  %v395_v19 = vld [vmem:[#allocation7 + $0x38] sm:$0xff] }
  0x3f   : > { %370 = vmatpush.msra.mxu0 %v359_v3  ;;  %v351_v20 = vld [vmem:[#allocation5 + $0x20] sm:$0xff]  ;;  %v394_v21 = vld [vmem:[#allocation7 + $0x30] sm:$0xff]  ;;  %v350_v22 = vld [vmem:[#allocation5 + $0x18] sm:$0xff] }
  0x40   : > { %411 = vmatpush.msra.mxu1 %v400_v9  ;;  %v393_v23 = vld [vmem:[#allocation7 + $0x28] sm:$0xff]  ;;  %v349_v24 = vld [vmem:[#allocation5 + $0x10] sm:$0xff]  ;;  %v392_v25 = vld [vmem:[#allocation7 + $0x20] sm:$0xff] }
  0x41   : > { %371 = vmatpush.msra.mxu0 %v358_v5  ;;  %v348_v26 = vld [vmem:[#allocation5 + $0x8] sm:$0xff]  ;;  %v391_v27 = vld [vmem:[#allocation7 + $0x18] sm:$0xff]  ;;  %v347_v28 = vld [vmem:[#allocation5] sm:$0xff] }
  0x42   : > { %412 = vmatpush.msra.mxu1 %v399_v11  ;;  %v346_v29 = vld [vmem:[%s1039_s1] sm:$0xff]  ;;  %v389_v31 = vld [vmem:[#allocation7 + $0x8] sm:$0xff]  ;;  %v388_v32 = vld [vmem:[#allocation7] sm:$0xff]  ;;  %s485_s1 = sshll.u32 %s481_s19, 4  ;;  %s486_s1 = int_to_ptr.hbm [resolvable:$true] %s485_s1 }
  0x43   : > { %372 = vmatpush.msra.mxu0 %v357_v8  ;;  %v390_v30 = vld [vmem:[#allocation7 + $0x10] sm:$0xff]  ;;  %v444_v33 = vld [vmem:[#allocation8 + $0x78] sm:$0xff]  ;;  %v442_v35 = vld [vmem:[#allocation8 + $0x68] sm:$0xff]  ;;  %s819_s8 = sshra.s32 %s486_s1, 4  ;;  %s820_s8 = int_to_ptr.hbm [resolvable:$true] %s819_s8 }
  0x44   : > { %413 = vmatpush.msra.mxu1 %v398_v13  ;;  %v443_v34 = vld [vmem:[#allocation8 + $0x70] sm:$0xff]  ;;  %449 = vmatpush.msra.mxu2 %v444_v33  ;;  %v441_v36 = vld [vmem:[#allocation8 + $0x60] sm:$0xff]  ;;  %v440_v37 = vld [vmem:[#allocation8 + $0x58] sm:$0xff]  ;;  %s821_s13 = scalar_lea.hbm %s820_s8, 8  ;;  %p826_p12 = scmp.lt.s32.totalorder %s820_s8, %s1105_s7 }
  0x45   : > { %373 = vmatpush.msra.mxu0 %v356_v10  ;;  %v439_v38 = vld [vmem:[#allocation8 + $0x50] sm:$0xff]  ;;  %v438_v39 = vld [vmem:[#allocation8 + $0x48] sm:$0xff]  ;;  %v437_v40 = vld [vmem:[#allocation8 + $0x40] sm:$0xff]  ;;  %p822_p1 = scmp.ne.s32.totalorder %s820_s8, %s821_s13  ;;  %p827_p8 = scmp.lt.s32.totalorder %s825_s29, %s821_s13 }
  0x46   : > { %414 = vmatpush.msra.mxu1 %v397_v15  ;;  %450 = vmatpush.msra.mxu2 %v443_v34  ;;  %v436_v41 = vld [vmem:[#allocation8 + $0x38] sm:$0xff]  ;;  %v435_v42 = vld [vmem:[#allocation8 + $0x30] sm:$0xff]  ;;  %v434_v43 = vld [vmem:[#allocation8 + $0x28] sm:$0xff] }
  0x47   : > { %374 = vmatpush.msra.mxu0 %v355_v12  ;;  %v433_v44 = vld [vmem:[#allocation8 + $0x20] sm:$0xff]  ;;  %v432_v45 = vld [vmem:[#allocation8 + $0x18] sm:$0xff]  ;;  %v682_v46 = vld [vmem:[%s1100_s2] ss:$0 sm:$0xff]  ;;  %p823_p3 = pnand %p822_p1, %p1002_p13  ;;  %p828_p7 = por %p827_p8, %p826_p12 }
  0x48   : > { %415 = vmatpush.msra.mxu1 %v396_v17  ;;  %451 = vmatpush.msra.mxu2 %v442_v35  ;;  %v431_v50 = vld [vmem:[#allocation8 + $0x10] sm:$0xff]  ;;  %v430_v51 = vld [vmem:[#allocation8 + $0x8] sm:$0xff]  ;;  %v429_v52 = vld [vmem:[#allocation8] sm:$0xff] }
  0x49   : > { %375 = vmatpush.msra.mxu0 %v354_v14  ;;  %v683_v53 = vld [vmem:[%s1102_s4] ss:$0 sm:$0xff]  ;;  %p824_p5 = pneg %p823_p3 }
  0x4a   : > { %416 = vmatpush.msra.mxu1 %v395_v19  ;;  %452 = vmatpush.msra.mxu2 %v441_v36  ;;  %v684_v57 = vld [vmem:[%s1104_s6] ss:$0 sm:$0xff] }
  0x4b   : > { %376 = vmatpush.msra.mxu0 %v353_v16  ;;  %p829_p9 = pnand %p828_p7, %p824_p5 }
  0x4c   : > { %417 = vmatpush.msra.mxu1 %v394_v21  ;;  %453 = vmatpush.msra.mxu2 %v440_v37 }
  0x4d   : > { %377 = vmatpush.msra.mxu0 %v352_v18 }
  0x4e   : > { %418 = vmatpush.msra.mxu1 %v393_v23  ;;  %454 = vmatpush.msra.mxu2 %v439_v38 }
  0x4f   : > { %378 = vmatpush.msra.mxu0 %v351_v20 }
  0x50   : > { %419 = vmatpush.msra.mxu1 %v392_v25  ;;  %455 = vmatpush.msra.mxu2 %v438_v39 }
  0x51   : > { %379 = vmatpush.msra.mxu0 %v350_v22 }
  0x52   : > { %420 = vmatpush.msra.mxu1 %v391_v27  ;;  %456 = vmatpush.msra.mxu2 %v437_v40 }
  0x53   : > { %380 = vmatpush.msra.mxu0 %v349_v24 }
  0x54   : > { %421 = vmatpush.msra.mxu1 %v390_v30  ;;  %457 = vmatpush.msra.mxu2 %v436_v41 }
  0x55   : > { %381 = vmatpush.msra.mxu0 %v348_v26 }
  0x56   : > { %422 = vmatpush.msra.mxu1 %v389_v31  ;;  %458 = vmatpush.msra.mxu2 %v435_v42 }
  0x57   : > { %382 = vmatpush.msra.mxu0 %v347_v28 }
  0x58   : > { %383 = vmatmul.f32.vlgmr.msra.gmra.mxu0 %v346_v29  ;;  %423 = vmatpush.msra.mxu1 %v388_v32 }
  0x59   : > { %459 = vmatpush.msra.mxu2 %v434_v43 }
  0x5b   : > { %460 = vmatpush.msra.mxu2 %v433_v44 }
  0x5d   : > { %461 = vmatpush.msra.mxu2 %v432_v45 }
  0x5f   : > { %462 = vmatpush.msra.mxu2 %v431_v50 }
  0x61   : > { %463 = vmatpush.msra.mxu2 %v430_v51 }
  0x63   : > { %464 = vmatpush.msra.mxu2 %v429_v52 }
  0xd5   : > { %v384_v47 = vpop.f32.mrf.mxu0 }
  0xd6   : > { %v385_v48 = vadd.f32 %v682_v46, %v384_v47 }
  0xd8   : > { %v387_v49 = vmax.f32 %v385_v48, 0.0 }
  0xda   : > { %424 = vmatmul.f32.vlgmr.msra.gmra.mxu1 %v387_v49 }
 0x157   : > { %v425_v54 = vpop.f32.mrf.mxu1 }
 0x158   : > { %v426_v55 = vadd.f32 %v683_v53, %v425_v54 }
 0x15a   : > { %v428_v56 = vmax.f32 %v426_v55, 0.0 }
 0x15c   : > { %465 = vmatmul.f32.vlgmr.msra.gmra.mxu2 %v428_v56 }
 0x1df   : > { %v466_v58 = vpop.f32.mrf.mxu2 }
 0x1e0   : > { %v467_v59 = vadd.f32 %v684_v57, %v466_v58 }
 0x1e2   : > { %469 = vst [vmem:[%s345_s21] sm:$0xff] %v467_v59 }
 0x1e3   : > { %832 = shalt.err (!%p829_p9)
}
 0x1e4   : > { %617 = dma.vmem_to_hbm [thread:$0]  (%p1002_p13), %s484_s18, 128, %s486_s1, %s471_s9  }
 0x1e5 PF: > { %s497_s15 = sand.u32 1, %s867_s24   ;;  %p1114_p10 = scmp.ge.s32.totalorder %s879_s27, 2 }
 0x1e6   : > { %s498_s30 = scalar_lea.sflag [#allocation4], %s497_s15 }
 0x1e7   : > { %p634_p11 = pnand %p1114_p10, %p1007_p4 }
 0x1e9   : > { %p635_p0 = pneg %p634_p11 }
 0x1eb   : > { %862 = dma.done.wait (%p635_p0), %s498_s30, 128  }
 0x1ec   : > { %864 = vsyncadd (%p635_p0), %s498_s30, 4294967168  ;;  %p22_p2 = scmp.ge.s32.totalorder %s982_s10, 4   ;;  %s1115_s24 = smov %s871_s25 }
 0x1ed   : > { %s1116_s25 = smov %s875_s26  ;;  %s1117_s26 = smov %s994_s11 }
 0x1ee   : > { %s1118_s27 = smov %s982_s10  ;;  %24 = sbr.rel (!%p22_p2) target bundleno = 9 (0x9), region = 105 }
 0x1f3   :  { %504 = vsyncpa [#allocation3], 1 }
 0x1f4   :  { %506 = vsyncpa [#allocation3 + $0x1], 1 }
 0x1f5   :  { %507 = vsyncpa [#allocation6], 1 }
 0x1f6   :  { %508 = vsyncpa [#allocation9], 1 }
 0x1f7   :  { %509 = vsyncpa [#allocation4], 1 }
 0x1f8   :  { %511 = vsyncpa [#allocation4 + $0x1], 1 }

</bundles_post_ra>
